<compile_context>
chip_gen: v7x
topology: tpu7x:2x2x1
jax: 0.10.0
libtpu: 0.0.40
codegen_flags: <defaults>
</compile_context>

<pallas_src>
import functools
import math

import jax
import jax.numpy as jnp
from jax import lax
from jax.experimental import pallas as pl
from jax.experimental.pallas import tpu as pltpu


# ---------------------------------------------------------------------------
# Hardware-aware knobs
# ---------------------------------------------------------------------------
@functools.lru_cache(maxsize=None)
def _vmem_limit_bytes():
  """~75% of physical VMEM, capped at 96 MiB (v5e/v6e -> 96 MiB, v7x -> 48)."""
  cap = 128 * 1024 * 1024
  try:
    info = pltpu.get_tpu_info()
    cap = getattr(info, "vmem_capacity_bytes", cap) or cap
  except Exception:  # unknown chip / interpret mode
    pass
  return int(min(96 * 1024 * 1024, cap * 3 // 4))


@functools.lru_cache(maxsize=None)
def _compiler_params():
  return pltpu.CompilerParams(
      dimension_semantics=("parallel", "parallel", "arbitrary"),
      vmem_limit_bytes=_vmem_limit_bytes())


def _cout_tile(cout):
  # 256-wide output tiles fill the 256x256 MXU on v6e/v7x; on v5e they are
  # simply two 128-wide MXU passes.
  if cout % 256 == 0:
    return 256
  if cout % 128 == 0:
    return 128
  return cout


def _pick_row_tile(h, w, cin, stride, dilation, row_cap=None):
  """Largest row tile dividing H, multiple of lcm(stride, dilation), fitting a
  rough VMEM budget (bf16 body block double-buffered + f32 padded tile + f32
  depthwise accumulator)."""
  step = stride * dilation // math.gcd(stride, dilation)
  assert h % step == 0, (h, stride, dilation)
  per_row = w * cin * (2 * 2 + 4 + 4)        # bytes kept live per input row
  cap = max(step, (_vmem_limit_bytes() // 3) // max(per_row, 1))
  if row_cap is not None:
    cap = min(cap, max(step, row_cap))
  best = step
  for t in range(step, h + 1, step):
    if h % t == 0 and t <= cap:
      best = t
  return best


# ---------------------------------------------------------------------------
# Kernels
# ---------------------------------------------------------------------------
def _sepconv_unit_kernel(body_ref, top_ref, bot_ref, dww_ref, bn1s_ref,
                         bn1b_ref, pww_ref, bn2s_ref, bn2b_ref, *rest,
                         dilation, stride, relu_in, fuse_residual,
                         relu_residual, n_h_tiles):
  """[ReLU] -> depthwise 3x3 (dilated, stride folded) -> BN -> 1x1 (bf16 MXU)
  -> BN [+ residual].

  grid = (N, H/TH, Cout/TCo), Cout innermost.  The depthwise+BN1 result of
  the current (n, h) row tile is computed once (co == 0) into a VMEM scratch
  and re-used for every output-channel tile.  Each depthwise tap is a single
  flattened pltpu.roll (row+column shift combined) + edge mask + MAC.
  """
  if fuse_residual:
    res_ref, o_ref, acc_ref = rest
  else:
    o_ref, acc_ref = rest
  h = pl.program_id(1)
  co = pl.program_id(2)
  d = dilation
  th = body_ref.shape[1]
  w = body_ref.shape[2]
  cin = body_ref.shape[3]
  tho = th // stride
  wo = w // stride
  flat_len = (th + 2 * d) * w

  @pl.when(co == 0)
  def _():
    # Row tile + d-row halos, assembled with an in-register concat (no scratch
    # round trip).  Boundary halos are zeroed with jnp.where (NaN/inf safe),
    # reproducing the conv zero padding.
    body = body_ref[...][0].astype(jnp.float32).reshape(th * w, cin)
    top = top_ref[...][0].astype(jnp.float32).reshape(d * w, cin)
    bot = bot_ref[...][0].astype(jnp.float32).reshape(d * w, cin)
    top = jnp.where(h > 0, top, jnp.zeros_like(top))
    bot = jnp.where(h < n_h_tiles - 1, bot, jnp.zeros_like(bot))
    x = jnp.concatenate([top, body, bot], axis=0)        # ((TH+2d)*W, Cin)
    if relu_in:
      x = jnp.maximum(x, 0.0)

    dww = dww_ref[...]                                   # (9, Cin)
    col = lax.broadcasted_iota(jnp.int32, (th * w, 1), 0) % w
    mask_l = col >= d                                    # kw == 0 taps valid
    mask_r = col < (w - d)                               # kw == 2 taps valid
    acc = jnp.zeros((th * w, cin), jnp.float32)
    for kh in range(3):
      for kw in range(3):
        # Combined row+column shift for tap (kh, kw) as one XLU roll of the
        # flattened padded tile; the slice [0:th*w] starts at 0 (aligned).
        off = kh * d * w + (kw - 1) * d
        xs = x if off == 0 else pltpu.roll(x, (-off) % flat_len, axis=0)
        xs = xs[0:th * w]
        # Column edge mask also covers the roll wrap-around: the only wrapped
        # flat indices fall on columns the mask zeroes.
        if kw == 0:
          xs = jnp.where(mask_l, xs, 0.0)
        elif kw == 2:
          xs = jnp.where(mask_r, xs, 0.0)
        acc = acc + xs * dww[kh * 3 + kw]

    acc = acc.reshape(th, w, cin)
    if stride > 1:
      # In-kernel row subsample (untiled-dim split, no relayout).
      acc = acc.reshape(tho, stride, w, cin)[:, 0]
    acc = acc * bn1s_ref[...] + bn1b_ref[...]            # BN on depthwise out
    acc_ref[...] = acc.astype(acc_ref.dtype)

  # Pointwise 1x1 for this Cout tile: bf16 operands, f32 accumulation (MXU).
  if stride > 1:
    # In-kernel column subsample via a strided read of the cached rows, so the
    # MXU / BN2 / HBM writes only ever see the strided output.
    a = acc_ref[:, pl.ds(0, wo, stride=stride), :]       # (THo, Wo, Cin)
  else:
    a = acc_ref[...]
  a = a.reshape(tho * wo, cin).astype(jnp.bfloat16)
  y = jnp.dot(a, pww_ref[...], preferred_element_type=jnp.float32)
  y = y * bn2s_ref[...] + bn2b_ref[...]                  # BN on pointwise out
  y = y.reshape(o_ref.shape)
  if fuse_residual:
    res = res_ref[...].astype(jnp.float32)
    if relu_residual:                 # identity skip with in-place-ReLU'd inp
      res = jnp.maximum(res, 0.0)
    y = y + res
  o_ref[...] = y.astype(o_ref.dtype)


def _pointwise_bn_kernel(x_ref, w_ref, s_ref, b_ref, o_ref, *, apply_relu,
                         stride):
  """[ReLU] -> strided 1x1 conv (bf16 MXU) -> BN   (the Block skip branch).

  The stride-2 H/W subsample happens in-kernel (strided column read + row
  decimation); there is no wrapper-side strided slice / extra HBM pass."""
  tho = x_ref.shape[1] // stride
  wo = x_ref.shape[2] // stride
  cin = x_ref.shape[3]
  if stride > 1:
    x = x_ref[:, :, pl.ds(0, wo, stride=stride), :][0]   # (TH_in, Wo, Cin)
  else:
    x = x_ref[...][0]                                    # (TH_in, W, Cin)
  x = x.astype(jnp.float32)
  if apply_relu:
    x = jnp.maximum(x, 0.0)
  if stride > 1:
    x = x.reshape(tho, stride, wo, cin)[:, 0]            # row subsample
  y = jnp.dot(x.reshape(tho * wo, cin).astype(jnp.bfloat16), w_ref[...],
              preferred_element_type=jnp.float32)
  y = y * s_ref[...] + b_ref[...]
  o_ref[...] = y.reshape(o_ref.shape).astype(o_ref.dtype)


# ---------------------------------------------------------------------------
# Wrappers (tiling / glue)
# ---------------------------------------------------------------------------
def sepconv_unit(x, unit, residual=None, relu_residual=False, row_cap=None):
  """x: (N, H, W, Cin) NHWC bf16 -> (N, H//s, W//s, Cout) bf16.

  If `residual` is given it is added inside the kernel (fused Block epilogue;
  valid for stride-1 AND stride-2 units since the H/W subsample is in-kernel).
  """
  N, H, W, cin = x.shape
  d, s, cout = unit["dilation"], unit["stride"], unit["cout"]
  assert H % d == 0 and H % s == 0 and W % s == 0
  th = _pick_row_tile(H, W, cin, s, d, row_cap)
  n_h = H // th
  tho, wo, ho = th // s, W // s, H // s
  tco = _cout_tile(cout)
  n_co = cout // tco
  if residual is not None:
    assert residual.shape == (N, ho, wo, cout), residual.shape

  hk = th // d                   # halo block stride, in d-row blocks
  h_halo_max = H // d - 1

  kernel = functools.partial(
      _sepconv_unit_kernel, dilation=d, stride=s, relu_in=unit["relu"],
      fuse_residual=residual is not None, relu_residual=relu_residual,
      n_h_tiles=n_h)

  in_specs = [
      pl.BlockSpec((1, th, W, cin), lambda n, h, co: (n, h, 0, 0)),
      pl.BlockSpec((1, d, W, cin),
                   lambda n, h, co: (n, jnp.maximum(h * hk - 1, 0), 0, 0)),
      pl.BlockSpec((1, d, W, cin),
                   lambda n, h, co: (n, jnp.minimum((h + 1) * hk, h_halo_max),
                                     0, 0)),
      pl.BlockSpec((9, cin), lambda n, h, co: (0, 0)),
      pl.BlockSpec((1, cin), lambda n, h, co: (0, 0)),
      pl.BlockSpec((1, cin), lambda n, h, co: (0, 0)),
      pl.BlockSpec((cin, tco), lambda n, h, co: (0, co)),
      pl.BlockSpec((1, tco), lambda n, h, co: (0, co)),
      pl.BlockSpec((1, tco), lambda n, h, co: (0, co)),
  ]
  args = [x, x, x, unit["dw_w"], unit["bn1_scale"], unit["bn1_shift"],
          unit["pw_w"], unit["bn2_scale"], unit["bn2_shift"]]
  if residual is not None:
    in_specs.append(pl.BlockSpec((1, tho, wo, tco),
                                 lambda n, h, co: (n, h, 0, co)))
    args.append(residual)

  # Depthwise+BN1 cache, reused across Cout tiles.  bf16 for stride-1 units;
  # f32 for stride-2 so the strided column read is a plain 32-bit gather.
  cache_dtype = jnp.bfloat16 if s == 1 else jnp.float32

  return pl.pallas_call(
      kernel,
      out_shape=jax.ShapeDtypeStruct((N, ho, wo, cout), jnp.bfloat16),
      grid=(N, n_h, n_co),
      in_specs=in_specs,
      out_specs=pl.BlockSpec((1, tho, wo, tco), lambda n, h, co: (n, h, 0, co)),
      scratch_shapes=[pltpu.VMEM((tho, W, cin), cache_dtype)],
      compiler_params=_compiler_params(),
  )(*args)


def pointwise_bn(x, skip_params, apply_relu, stride=1, row_cap=None):
  """[ReLU] -> strided 1x1 conv -> BN (skip branch), tiled (N, H/TH, Cout/TCo).
  """
  N, H, W, cin = x.shape
  cout = skip_params["w"].shape[1]
  assert H % stride == 0 and W % stride == 0
  th_in = _pick_row_tile(H, W, cin, stride, 1, row_cap)
  n_h = H // th_in
  tho, wo, ho = th_in // stride, W // stride, H // stride
  tco = _cout_tile(cout)
  n_co = cout // tco
  kernel = functools.partial(_pointwise_bn_kernel, apply_relu=apply_relu,
                             stride=stride)
  return pl.pallas_call(
      kernel,
      out_shape=jax.ShapeDtypeStruct((N, ho, wo, cout), jnp.bfloat16),
      grid=(N, n_h, n_co),
      in_specs=[
          pl.BlockSpec((1, th_in, W, cin), lambda n, h, co: (n, h, 0, 0)),
          pl.BlockSpec((cin, tco), lambda n, h, co: (0, co)),
          pl.BlockSpec((1, tco), lambda n, h, co: (0, co)),
          pl.BlockSpec((1, tco), lambda n, h, co: (0, co)),
      ],
      out_specs=pl.BlockSpec((1, tho, wo, tco), lambda n, h, co: (n, h, 0, co)),
      compiler_params=_compiler_params(),
  )(x, skip_params["w"], skip_params["scale"], skip_params["shift"])


# ---------------------------------------------------------------------------
# Parameter construction (mirrors Block.__init__), inference-mode BN folded
# ---------------------------------------------------------------------------
def _fold_bn(key, c, eps=1e-5):
  k1, k2, k3, k4 = jax.random.split(key, 4)
  weight = 1.0 + 0.1 * jax.random.normal(k1, (c,), jnp.float32)
  bias = 0.1 * jax.random.normal(k2, (c,), jnp.float32)
  running_mean = 0.1 * jax.random.normal(k3, (c,), jnp.float32)
  running_var = 0.5 + jnp.abs(jax.random.normal(k4, (c,), jnp.float32))
  scale = weight / jnp.sqrt(running_var + eps)
  shift = bias - running_mean * scale
  return scale.reshape(1, c), shift.reshape(1, c)


def make_block_params(key, inplanes, planes, reps, stride=1, dilation=1,
                      start_with_relu=True, grow_first=True, is_last=False):
  unit_cfgs = []
  filters = inplanes
  if grow_first:
    unit_cfgs.append((inplanes, planes, 1, dilation))
    filters = planes
  for _ in range(reps - 1):
    unit_cfgs.append((filters, filters, 1, dilation))
  if not grow_first:
    unit_cfgs.append((inplanes, planes, 1, dilation))
  if stride != 1:
    unit_cfgs.append((planes, planes, 2, 1))
  if stride == 1 and is_last:
    unit_cfgs.append((planes, planes, 1, 1))

  units = []
  for i, (cin, cout, ustride, udil) in enumerate(unit_cfgs):
    key, k_dw, k_pw, k_bn1, k_bn2 = jax.random.split(key, 5)
    bn1_scale, bn1_shift = _fold_bn(k_bn1, cin)
    bn2_scale, bn2_shift = _fold_bn(k_bn2, cout)
    units.append(dict(
        cin=cin, cout=cout, stride=ustride, dilation=udil,
        relu=(start_with_relu if i == 0 else True),
        dw_w=0.2 * jax.random.normal(k_dw, (9, cin), jnp.float32),
        bn1_scale=bn1_scale, bn1_shift=bn1_shift,
        # pointwise weights stored in bf16 (MXU operand dtype)
        pw_w=(0.2 * jax.random.normal(k_pw, (cin, cout), jnp.float32)
              ).astype(jnp.bfloat16),
        bn2_scale=bn2_scale, bn2_shift=bn2_shift,
    ))

  if planes != inplanes or stride != 1:
    key, k_sw, k_sbn = jax.random.split(key, 3)
    s_scale, s_shift = _fold_bn(k_sbn, planes)
    skip = dict(
        w=(0.2 * jax.random.normal(k_sw, (inplanes, planes), jnp.float32)
           ).astype(jnp.bfloat16),
        scale=s_scale, shift=s_shift)
  else:
    skip = None

  return dict(units=units, skip=skip, stride=stride,
              start_with_relu=start_with_relu)


# ---------------------------------------------------------------------------
# Block.forward
# ---------------------------------------------------------------------------
def block_forward(x_nchw, params, row_cap=None):
  # NCHW -> NHWC; inter-unit activations and the residual live in bf16 in HBM.
  x = jnp.transpose(x_nchw, (0, 2, 3, 1)).astype(jnp.bfloat16)
  inp = x
  units = params["units"]
  s = params["stride"]
  start_relu = params["start_with_relu"]

  # Residual branch.  The PyTorch in-place ReLU at the start of `rep` mutates
  # inp, so the skip branch sees relu(inp) when start_with_relu=True.
  if params["skip"] is not None:
    residual = pointwise_bn(inp, params["skip"], apply_relu=start_relu,
                            stride=s, row_cap=row_cap)
    relu_residual = False
  else:
    residual = inp                # identity skip (stride 1, planes==inplanes)
    relu_residual = start_relu

  # The residual add is always fused into the last unit's kernel (the output
  # spatial/channel shape matches the residual by construction).
  last = len(units) - 1
  for i, u in enumerate(units):
    x = sepconv_unit(x, u,
                     residual=residual if i == last else None,
                     relu_residual=relu_residual if i == last else False,
                     row_cap=row_cap)
  return jnp.transpose(x, (0, 3, 1, 2)).astype(jnp.float32)    # back to NCHW


# ---------------------------------------------------------------------------
# Pure-JAX reference (lax.conv), mirroring the kernel's bf16 storage points
# ---------------------------------------------------------------------------
def _pointwise_ref(x, w_bf16):
  n, h, ww, c = x.shape
  y = lax.dot_general(
      x.reshape(n * h * ww, c).astype(jnp.bfloat16), w_bf16,
      (((1,), (0,)), ((), ())), preferred_element_type=jnp.float32)
  return y.reshape(n, h, ww, -1)


def _bf16_round(x):
  return x.astype(jnp.bfloat16).astype(jnp.float32)


def block_reference(x_nchw, params):
  x = _bf16_round(jnp.transpose(x_nchw, (0, 2, 3, 1)).astype(jnp.float32))
  inp = x
  last = len(params["units"]) - 1
  for i, u in enumerate(params["units"]):
    if u["relu"]:
      x = jnp.maximum(x, 0.0)
    d, s, cin = u["dilation"], u["stride"], u["cin"]
    wdw = u["dw_w"].reshape(3, 3, cin)[:, :, None, :]            # HWIO grouped
    x = lax.conv_general_dilated(
        x, wdw, window_strides=(s, s), padding=[(d, d), (d, d)],
        rhs_dilation=(d, d), dimension_numbers=("NHWC", "HWIO", "NHWC"),
        feature_group_count=cin, precision=lax.Precision.HIGHEST)
    x = x * u["bn1_scale"][0] + u["bn1_shift"][0]
    x = _pointwise_ref(x, u["pw_w"])
    x = x * u["bn2_scale"][0] + u["bn2_shift"][0]
    if i != last:
      x = _bf16_round(x)          # bf16 inter-unit activations in HBM
  s = params["stride"]
  skip_src = jnp.maximum(inp, 0.0) if params["start_with_relu"] else inp
  if params["skip"] is not None:
    si = skip_src[:, ::s, ::s, :]
    skip = _pointwise_ref(si, params["skip"]["w"])
    skip = skip * params["skip"]["scale"][0] + params["skip"]["shift"][0]
    skip = _bf16_round(skip)
  else:
    skip = skip_src
  return jnp.transpose(_bf16_round(x + skip), (0, 3, 1, 2))


if __name__ == "__main__":
  key = jax.random.PRNGKey(0)
  N, H, W = 2, 16, 16
  configs = [
      # entry-flow style: conv skip, stride 1, fused residual add in-kernel
      (dict(inplanes=8, planes=16, reps=2, stride=1, dilation=1,
            start_with_relu=True, grow_first=True, is_last=False), None),
      # entry-flow style: conv skip, stride 2 (H+W subsample fully in-kernel,
      # residual fused into the stride-2 unit); forced multi-row-tile grid to
      # exercise halos.
      (dict(inplanes=8, planes=16, reps=2, stride=2, dilation=1,
            start_with_relu=False, grow_first=True, is_last=False), 8),
      # middle-flow style: identity skip, dilation 2, three reps; forced small
      # row tile to exercise the dilated halo path.
      (dict(inplanes=16, planes=16, reps=3, stride=1, dilation=2,
            start_with_relu=True, grow_first=True, is_last=False), 4),
  ]
  for i, (cfg, row_cap) in enumerate(configs):
    key, kx, kp = jax.random.split(key, 3)
    x = jax.random.normal(kx, (N, cfg["inplanes"], H, W), jnp.float32)  # NCHW
    params = make_block_params(kp, **cfg)
    out = jax.block_until_ready(block_forward(x, params, row_cap=row_cap))
    s = cfg["stride"]
    assert out.shape == (N, cfg["planes"], H // s, W // s), out.shape
    ref = block_reference(x, params)
    err = float(jnp.max(jnp.abs(out - ref)))
    if not jnp.allclose(out, ref, rtol=2e-2, atol=2e-2):
      raise AssertionError(
          f"config {i}: mismatch vs reference, max abs err = {err}")
  print("KERNEL_OK")
</pallas_src>

<mosaic_0001>
module attributes {stable_mosaic.version = 11 : i64} {
  func.func @_pointwise_bn_kernel(%arg0: i32, %arg1: i32, %arg2: i32, %arg3: memref<1x16x16x8xbf16, #tpu.memory_space<vmem>>, %arg4: memref<8x16xbf16, #tpu.memory_space<vmem>>, %arg5: memref<1x16xf32, #tpu.memory_space<vmem>>, %arg6: memref<1x16xf32, #tpu.memory_space<vmem>>, %arg7: memref<1x16x16x16xbf16, #tpu.memory_space<vmem>>) attributes {dimension_semantics = [#tpu.dimension_semantics<parallel>, #tpu.dimension_semantics<parallel>, #tpu.dimension_semantics<arbitrary>], iteration_bounds = array<i64: 2, 1, 1>, scalar_prefetch = 0 : i64, scratch_operands = 0 : i64, tpu.core_type = #tpu.core_type<tc>, window_params = [{transform_indices = @transform_0, window_bounds = array<i64: 1, 16, 16, 8>}, {transform_indices = @transform_1, window_bounds = array<i64: 8, 16>}, {transform_indices = @transform_2, window_bounds = array<i64: 1, 16>}, {transform_indices = @transform_3, window_bounds = array<i64: 1, 16>}, {transform_indices = @transform_4, window_bounds = array<i64: 1, 16, 16, 16>}]} {
    %c0 = arith.constant 0 : index
    %c0_0 = arith.constant 0 : index
    %c0_1 = arith.constant 0 : index
    %c0_2 = arith.constant 0 : index
    %0 = vector.load %arg3[%c0, %c0_0, %c0_1, %c0_2] : memref<1x16x16x8xbf16, #tpu.memory_space<vmem>>, vector<1x16x16x8xbf16>
    %1 = vector.shape_cast %0 : vector<1x16x16x8xbf16> to vector<16x16x8xbf16>
    %2 = arith.extf %1 : vector<16x16x8xbf16> to vector<16x16x8xf32>
    %cst = arith.constant 0.000000e+00 : f32
    %3 = vector.broadcast %cst : f32 to vector<16x16x8xf32>
    %4 = arith.maximumf %2, %3 : vector<16x16x8xf32>
    %5 = vector.shape_cast %4 : vector<16x16x8xf32> to vector<256x8xf32>
    %6 = arith.truncf %5 : vector<256x8xf32> to vector<256x8xbf16>
    %c0_3 = arith.constant 0 : index
    %c0_4 = arith.constant 0 : index
    %7 = vector.load %arg4[%c0_3, %c0_4] : memref<8x16xbf16, #tpu.memory_space<vmem>>, vector<8x16xbf16>
    %cst_5 = arith.constant dense<0.000000e+00> : vector<256x16xf32>
    %8 = tpu.matmul %6, %7, %cst_5 {dimension_numbers = #tpu.dot_dimension_numbers<[1], [0], [0], [1], [0, 0, 1, 1], [], []>} : vector<256x8xbf16>, vector<8x16xbf16>, vector<256x16xf32> -> vector<256x16xf32>
    %c0_6 = arith.constant 0 : index
    %c0_7 = arith.constant 0 : index
    %9 = vector.load %arg5[%c0_6, %c0_7] : memref<1x16xf32, #tpu.memory_space<vmem>>, vector<1x16xf32>
    %10 = vector.broadcast %9 : vector<1x16xf32> to vector<256x16xf32>
    %11 = arith.mulf %8, %10 : vector<256x16xf32>
    %c0_8 = arith.constant 0 : index
    %c0_9 = arith.constant 0 : index
    %12 = vector.load %arg6[%c0_8, %c0_9] : memref<1x16xf32, #tpu.memory_space<vmem>>, vector<1x16xf32>
    %13 = vector.broadcast %12 : vector<1x16xf32> to vector<256x16xf32>
    %14 = arith.addf %11, %13 : vector<256x16xf32>
    %15 = vector.shape_cast %14 : vector<256x16xf32> to vector<1x16x16x16xf32>
    %16 = arith.truncf %15 : vector<1x16x16x16xf32> to vector<1x16x16x16xbf16>
    %c0_10 = arith.constant 0 : index
    %c0_11 = arith.constant 0 : index
    %c0_12 = arith.constant 0 : index
    %c0_13 = arith.constant 0 : index
    %17 = vector.load %arg7[%c0_10, %c0_11, %c0_12, %c0_13] : memref<1x16x16x16xbf16, #tpu.memory_space<vmem>>, vector<1x16x16x16xbf16>
    tpu.vector_store %arg7[%c0_10, %c0_11, %c0_12, %c0_13], %16 {strides = array<i32>} : memref<1x16x16x16xbf16, #tpu.memory_space<vmem>>, vector<1x16x16x16xbf16>,
    return
  }
  func.func @transform_0(%arg0: i32, %arg1: i32, %arg2: i32) -> (i32, i32, i32, i32) {
    %c0_i32 = arith.constant 0 : i32
    %c0_i32_0 = arith.constant 0 : i32
    %c0_i32_1 = arith.constant 0 : i32
    return %arg0, %arg1, %c0_i32, %c0_i32_0 : i32, i32, i32, i32
  }
  func.func @transform_1(%arg0: i32, %arg1: i32, %arg2: i32) -> (i32, i32) {
    %c0_i32 = arith.constant 0 : i32
    %c0_i32_0 = arith.constant 0 : i32
    return %c0_i32, %arg2 : i32, i32
  }
  func.func @transform_2(%arg0: i32, %arg1: i32, %arg2: i32) -> (i32, i32) {
    %c0_i32 = arith.constant 0 : i32
    %c0_i32_0 = arith.constant 0 : i32
    return %c0_i32, %arg2 : i32, i32
  }
  func.func @transform_3(%arg0: i32, %arg1: i32, %arg2: i32) -> (i32, i32) {
    %c0_i32 = arith.constant 0 : i32
    %c0_i32_0 = arith.constant 0 : i32
    return %c0_i32, %arg2 : i32, i32
  }
  func.func @transform_4(%arg0: i32, %arg1: i32, %arg2: i32) -> (i32, i32, i32, i32) {
    %c0_i32 = arith.constant 0 : i32
    %c0_i32_0 = arith.constant 0 : i32
    return %arg0, %arg1, %c0_i32, %arg2 : i32, i32, i32, i32
  }
}

</mosaic_0001>

<bundles_post_ra>
// kernel: tpu_custom_call.1
= control target key start
LH: loop header
LB: loop body
LE: loop exit
PB: predicated region body
PF: predicated region fallthrough
CT: control target
= control target key end

     0   :  { %9 = vsyncpa [#allocation3], 0  ;;  %s2044_s0 = inlined_call_operand.hbm [shape: bf16[2,16,16,8], index: 0, kind: input, shape index: {}]   ;;  %s2045_s1 = inlined_call_operand.hbm [shape: bf16[8,16], index: 1, kind: input, shape index: {}]   ;;  %s2046_s2 = inlined_call_operand.hbm [shape: f32[1,16], index: 2, kind: input, shape index: {}]   ;;  %s2047_s3 = inlined_call_operand.hbm [shape: f32[1,16], index: 3, kind: input, shape index: {}]   ;;  %s2048_s4 = inlined_call_operand.hbm [shape: bf16[2,16,16,16], index: 4, kind: output, shape index: {}]  }
   0x1   :  { %11 = vsyncpa [#allocation3 + $0x1], 0 }
   0x2   :  { %12 = vsyncpa [#allocation6], 0 }
   0x3   :  { %13 = vsyncpa [#allocation9], 0 }
   0x4   :  { %14 = vsyncpa [#allocation4], 0 }
   0x5   :  { %16 = vsyncpa [#allocation4 + $0x1], 0  ;;  %s1592_s15 = smov 0   ;;  %s1594_s16 = smov 0  }
   0x6   :  { %s1596_s17 = smov 0   ;;  %s1598_s18 = smov 0  }
   0x7   :  { %s1600_s19 = smov 0   ;;  %s1602_s20 = smov 0  }
   0x8 LB: > { %s1016_s21 = sadd.s32 4294967295, %s1556_s20   ;;  %s1017_s22 = sadd.s32 4294967294, %s1556_s20   ;;  %s1556_s20 = sphi %s1602_s20, %s22_s20   ;;  %s1552_s19 = sphi %s1600_s19, %s2072_s19   ;;  %s1548_s18 = sphi %s1598_s18, %s2071_s18   ;;  %s1544_s17 = sphi %s1596_s17, %s2070_s17   ;;  %s1540_s16 = sphi %s1594_s16, %s2069_s16   ;;  %s1536_s15 = sphi %s1592_s15, %s2068_s15  }
   0x9   : > { %p63_p0 = scmp.ne.s32.totalorder %s1540_s16, %s1536_s15  ;;  %p1626_p1 = scmp.eq.s32.totalorder %s1016_s21, 0 }
   0xa   : > { %p1630_p2 = scmp.eq.s32.totalorder %s1016_s21, 1  ;;  %p175_p3 = scmp.eq.s32.totalorder %s1017_s22, 1 }
   0xb   : > { %s2053_s23 = scalar_select %p1626_p1, 1, 0 }
   0xc   : > { %s2054_s24 = scalar_select %p1630_p2, 1, 0 }
   0xd   : > { %p1636_p4 = por %p1626_p1, %p63_p0  ;;  %p1018_p5 = scmp.ge.s32.totalorder %s1556_s20, 1 }
   0xe   : > { %p1641_p6 = por %p175_p3, %p63_p0  ;;  %p182_p7 = scmp.lt.s32.totalorder %s1556_s20, 3 }
   0xf   : > { %s2055_s25 = scalar_select %p1636_p4, 1, 0 }
  0x10   : > { %s2056_s26 = scalar_select %p1641_p6, 1, 0 }
  0x11   : > { %p1646_p8 = pnand %p1018_p5, %p182_p7  ;;  %s1558_s28 = smov [#allocation5]  }
  0x12   : > { %s197_s29 = sshll.u32 %s1558_s28, 4  ;;  %s1559_s30 = smov [#allocation7]   ;;  %s198_s29 = int_to_ptr.vmem [resolvable:$true] %s197_s29 }
  0x13   : > { %s2057_s27 = scalar_select %p1646_p8, 1, 0 }
  0x14   : > { %p1271_p10 = pneg %p1646_p8  ;;  %s210_s5 = sshll.u32 %s1559_s30, 4  ;;  %s1659_s5 = int_to_ptr.vmem [resolvable:$true] %s210_s5 }
  0x15   : > { %s1560_s7 = smov [#allocation8]   ;;  %s1352_s11 = scalar_lea.hbm %s2045_s1, 64 }
  0x16   : > { %p1655_p11 = pnand %p1271_p10, %p1626_p1  ;;  %s223_s8 = sshll.u32 %s1560_s7, 4  ;;  %s1661_s8 = int_to_ptr.vmem [resolvable:$true] %s223_s8 }
  0x17   : > { %p1353_p12 = scmp.ne.s32.totalorder %s2045_s1, %s1352_s11  ;;  %p1359_p5 = scmp.lt.u32.totalorder %s1352_s11, %s2045_s1 }
  0x18   : > { %p1671_p13 = pneg %p1655_p11 }
  0x1a   : > { %p1355_p0 = pnand %p1671_p13, %p1353_p12 }
  0x1c   : > { %p1356_p3 = pneg %p1355_p0 }
  0x1e   : > { %p1361_p7 = pnand %p1359_p5, %p1356_p3 }
  0x20   : > { %1364 = shalt.err (!%p1361_p7)
}
  0x21   : > { %s1365_s28 = scalar_lea.vmem %s198_s29, 64  ;;  %p1373_p1 = scmp.lt.s32.totalorder %s198_s29, %s198_s29 }
  0x22   : > { %p1366_p10 = scmp.ne.s32.totalorder %s198_s29, %s1365_s28  ;;  %p1374_p4 = scmp.lt.s32.totalorder %s1365_s28, %s1365_s28 }
  0x24   : > { %p1368_p9 = pnand %p1366_p10, %p1671_p13  ;;  %p1375_p8 = por %p1374_p4, %p1373_p1 }
  0x26   : > { %p1369_p6 = pneg %p1368_p9 }
  0x28   : > { %p1376_p2 = pnand %p1375_p8, %p1369_p6 }
  0x2a   : > { %1379 = shalt.err (!%p1376_p2)
}
  0x2b   : > { %1274 = dma.hbm_to_vmem [thread:$0]  (!%p1655_p11), %s2045_s1, 64, %s198_s29, [#allocation6]  }
  0x2c   : > { %s1380_s11 = scalar_lea.hbm %s2046_s2, 16 }
  0x2d   : > { %p1381_p9 = scmp.ne.s32.totalorder %s2046_s2, %s1380_s11  ;;  %p1387_p2 = scmp.lt.u32.totalorder %s1380_s11, %s2046_s2 }
  0x2f   : > { %p1383_p12 = pnand %p1381_p9, %p1671_p13 }
  0x31   : > { %p1384_p1 = pneg %p1383_p12 }
  0x33   : > { %p1389_p4 = pnand %p1387_p2, %p1384_p1 }
  0x35   : > { %1392 = shalt.err (!%p1389_p4)
}
  0x36   : > { %s1393_s29 = scalar_lea.vmem %s1659_s5, 16  ;;  %s1400_s28 = scalar_lea.vmem %s1659_s5, 32 }
  0x37   : > { %p1394_p6 = scmp.ne.s32.totalorder %s1659_s5, %s1393_s29  ;;  %p1401_p3 = scmp.lt.s32.totalorder %s1659_s5, %s1659_s5 }
  0x38   : > { %p1402_p5 = scmp.lt.s32.totalorder %s1400_s28, %s1393_s29 }
  0x39   : > { %p1396_p8 = pnand %p1394_p6, %p1671_p13 }
  0x3a   : > { %p1403_p7 = por %p1402_p5, %p1401_p3 }
  0x3b   : > { %p1397_p0 = pneg %p1396_p8 }
  0x3d   : > { %p1404_p10 = pnand %p1403_p7, %p1397_p0 }
  0x3f   : > { %1407 = shalt.err (!%p1404_p10)
}
  0x40   : > { %1277 = dma.hbm_to_vmem [thread:$0]  (!%p1655_p11), %s2046_s2, 16, %s1659_s5, [#allocation6]  }
  0x41   : > { %s1408_s11 = scalar_lea.hbm %s2047_s3, 16 }
  0x42   : > { %p1409_p9 = scmp.ne.s32.totalorder %s2047_s3, %s1408_s11  ;;  %p1415_p2 = scmp.lt.u32.totalorder %s1408_s11, %s2047_s3 }
  0x44   : > { %p1411_p12 = pnand %p1409_p9, %p1671_p13 }
  0x46   : > { %p1412_p1 = pneg %p1411_p12 }
  0x48   : > { %p1417_p4 = pnand %p1415_p2, %p1412_p1 }
  0x4a   : > { %1420 = shalt.err (!%p1417_p4)
}
  0x4b   : > { %s1421_s5 = scalar_lea.vmem %s1661_s8, 16  ;;  %s1428_s29 = scalar_lea.vmem %s1661_s8, 32 }
  0x4c   : > { %p1422_p6 = scmp.ne.s32.totalorder %s1661_s8, %s1421_s5  ;;  %p1429_p3 = scmp.lt.s32.totalorder %s1661_s8, %s1661_s8 }
  0x4d   : > { %p1430_p5 = scmp.lt.s32.totalorder %s1428_s29, %s1421_s5 }
  0x4e   : > { %p1424_p8 = pnand %p1422_p6, %p1671_p13 }
  0x4f   : > { %p1431_p7 = por %p1430_p5, %p1429_p3 }
  0x50   : > { %p1425_p0 = pneg %p1424_p8 }
  0x52   : > { %p1432_p10 = pnand %p1431_p7, %p1425_p0 }
  0x54   : > { %1435 = shalt.err (!%p1432_p10)
}
  0x55   : > { %1280 = dma.hbm_to_vmem [thread:$0]  (!%p1655_p11), %s2047_s3, 16, %s1661_s8, [#allocation9]  }
  0x56   : > { %s50_s14 = sadd.s32 1, %s1544_s17  ;;  %s41_s7 = sadd.s32 1, %s1552_s19 }
  0x57   : > { %p57_p13 = scmp.ne.s32.totalorder %s1544_s17, %s1540_s16  ;;  %p43_p9 = scmp.ge.s32.totalorder %s41_s7, 2 }
  0x58   : > { %p58_p12 = scmp.eq.s32.totalorder %s1556_s20, 0  ;;  %p2060_p1 = scmp.ne.s32.totalorder %s2054_s24, 0 }
  0x59   : > { %p1292_p4 = scmp.lt.s32.totalorder %s1556_s20, 2  ;;  %s2074_s7 = smov (%p43_p9, %s41_s7), 0 }
  0x5a   : > { %p1742_p2 = por %p2060_p1, %p57_p13  ;;  %p59_p6 = por %p58_p12, %p57_p13 }
  0x5b   : > { %s234_s9 = sand.u32 1, %s1544_s17   ;;  %s45_s10 = ssub.s32 %s1552_s19, %s2074_s7 }
  0x5c   : > { %p48_p8 = scmp.eq.s32.totalorder %s45_s10, 0  ;;  %s1023_s8 = sshll.u32 %s234_s9, 7 }
  0x5d   : > { %s1087_s11 = sshll.u32 %s1552_s19, 11  ;;  %s238_s22 = scalar_lea.vmem [#allocation2], %s1023_s8 }
  0x5e   : > { %s1754_s12 = scalar_select %p48_p8, %s1544_s17, %s50_s14  }
  0x5f   : > { %s1759_s24 = scalar_lea.hbm %s2044_s0, %s1087_s11  ;;  %s248_s5 = sshll.u32 %s238_s22, 4  ;;  %s1761_s5 = int_to_ptr.vmem [resolvable:$true] %s248_s5 }
  0x60   : > { %p1765_p11 = pnand %p1292_p4, %p59_p6  ;;  %s1769_s28 = scalar_lea.sflag [#allocation3], %s234_s9 }
  0x61   : > { %s1436_s30 = scalar_lea.hbm %s1759_s24, 2048  ;;  %s1441_s8 = scalar_lea.hbm %s2044_s0, 4096 }
  0x62   : > { %p1437_p0 = scmp.ne.s32.totalorder %s1759_s24, %s1436_s30  ;;  %p1438_p3 = pneg %p1765_p11 }
  0x63   : > { %p1442_p10 = scmp.lt.u32.totalorder %s1759_s24, %s2044_s0  ;;  %p1443_p13 = scmp.lt.u32.totalorder %s1441_s8, %s1436_s30 }
  0x64   : > { %p1439_p5 = pnand %p1438_p3, %p1437_p0  ;;  %p1445_p12 = scmp.lt.u32.totalorder %s1436_s30, %s1759_s24 }
  0x65   : > { %p1444_p9 = por %p1443_p13, %p1442_p10 }
  0x66   : > { %p1440_p7 = pneg %p1439_p5 }
  0x67   : > { %p1446_p1 = por %p1445_p12, %p1444_p9 }
  0x69   : > { %p1447_p4 = pnand %p1446_p1, %p1440_p7 }
  0x6b   : > { %1450 = shalt.err (!%p1447_p4)
}
  0x6c   : > { %s1451_s9 = scalar_lea.vmem %s1761_s5, 2048  ;;  %s1561_s21 = smov [#allocation2]  }
  0x6d   : > { %p1452_p6 = scmp.ne.s32.totalorder %s1761_s5, %s1451_s9  ;;  %s1456_s22 = sshll.u32 %s1561_s21, 4  ;;  %s1457_s22 = int_to_ptr.vmem [resolvable:$false] %s1456_s22 }
  0x6e   : > { %s1458_s14 = scalar_lea.vmem %s1457_s22, 4096  ;;  %p1459_p5 = scmp.lt.s32.totalorder %s1761_s5, %s1457_s22 }
  0x6f   : > { %p1454_p8 = pnand %p1452_p6, %p1438_p3  ;;  %p1460_p10 = scmp.lt.s32.totalorder %s1458_s14, %s1451_s9 }
  0x71   : > { %p1455_p0 = pneg %p1454_p8  ;;  %p1461_p13 = por %p1460_p10, %p1459_p5 }
  0x73   : > { %p1462_p9 = pnand %p1461_p13, %p1455_p0 }
  0x75   : > { %1465 = shalt.err (!%p1462_p9)
}
  0x76   : > { %s1562_s30 = smov 64   ;;  %s1563_s10 = smov 4  }
  0x77   : > { %1284 = dma.hbm_to_vmem [thread:$0]  (!%p1765_p11), %s1759_s24, 2048, %s1761_s5, %s1769_s28, %s1562_s30, %s1562_s30, %s1563_s10  }
  0x78   : > { %p2063_p3 = scmp.ne.s32.totalorder %s2057_s27, 0 }
  0x79   : > { %s1800_s8 = sand.u32 (!%p2063_p3), 1, %s1540_s16   ;;  %p2064_p7 = scmp.ne.s32.totalorder (!%p2063_p3), %s2055_s25, 0 }
  0x7a   : > { %260 = sbr.rel (%p2063_p3) target bundleno = 405 (0x195), region = 36  ;;  %s1027_s11 = sshll.u32 (!%p2063_p3), %s1800_s8, 7 }
  0x7b   : > { %s263_s13 = scalar_lea.sflag (!%p2063_p3), [#allocation3], %s1800_s8  ;;  %s1806_s9 = scalar_lea.vmem (!%p2063_p3), [#allocation2], %s1027_s11 }
  0x81   : > { %1519 = dma.done.wait (%p2064_p7), %s263_s13, 2048  }
  0x82   : > { %1521 = vsyncadd (%p2064_p7), %s263_s13, 4294965248  ;;  %p2065_p11 = scmp.ne.s32.totalorder %s2053_s23, 0 }
  0x84   : > { %1523 = dma.done.wait (%p2065_p11), [#allocation6], 80  }
  0x85   : > { %1525 = vsyncadd (%p2065_p11), [#allocation6], 4294967216 }
  0x86   : > { %1527 = dma.done.wait (%p2065_p11), [#allocation9], 16  }
  0x87   : > { %1529 = vsyncadd (%p2065_p11), [#allocation9], 4294967280  ;;  %vm468_vm0 = vcmask 1043456   ;;  %v418_v0 = vld [vmem:[#allocation5] sm:$0xf]  ;;  %vm419_vm1 = vcmask 64512  }
  0x88   : > { %v1122_v1 = vld [vmem:[%s1806_s9] sm:$0xff]   ;;  %1253 = vmatprep.subr.msk.bf16.mxu0 %vm468_vm0, %v418_v0  ;;  %1254 = vmatprep.subr.msk.bf16.mxu1 %vm468_vm0, %v418_v0  ;;  %v470_v3 = vsel %vm468_vm0, %v418_v0, 0  ;;  %v1185_v7 = vld [vmem:[%s1806_s9 + $0x8] sm:$0xff]   ;;  %v1186_v13 = vld [vmem:[%s1806_s9 + $0x10] sm:$0xff]   ;;  %vm839_vm2 = vcmask 125952   ;;  %s1873_s23 = scalar_lea.vmem [#allocation10], %s1027_s11 }
  0x89   : > { %v1192_v2 = vld [vmem:[%s1806_s9 + $0x40] sm:$0xff]   ;;  %v1123_v4 = vunpack.c.l.bf16 %v1122_v1  ;;  %v1124_v5 = vunpack.c.h.bf16 %v1122_v1  ;;  %v1193_v8 = vld [vmem:[%s1806_s9 + $0x48] sm:$0xff]   ;;  %1218 = vmatpush3.bf16.msra.mxu0 %v470_v3  ;;  %1252 = vmatpush3.bf16.msra.mxu1 %v470_v3  ;;  %v1127_v10 = vunpack.c.l.bf16 %v1185_v7  ;;  %v1128_v11 = vunpack.c.h.bf16 %v1185_v7  ;;  %v1194_v18 = vld [vmem:[%s1806_s9 + $0x50] sm:$0xff]   ;;  %s1120_s25 = sshll.u32 %s1548_s18, 11  ;;  %s890_s27 = sshll.u32 %s1873_s23, 4  ;;  %s1985_s27 = int_to_ptr.vmem [resolvable:$true] %s890_s27 }
  0x8a   : > { %v1155_v6 = vunpack.c.l.bf16 %v1192_v2  ;;  %v1156_v9 = vunpack.c.h.bf16 %v1192_v2  ;;  %v1159_v12 = vunpack.c.l.bf16 %v1193_v8  ;;  %v1160_v17 = vunpack.c.h.bf16 %v1193_v8  ;;  %v1187_v23 = vld [vmem:[%s1806_s9 + $0x18] sm:$0xff]   ;;  %v1188_v33 = vld [vmem:[%s1806_s9 + $0x20] sm:$0xff]   ;;  %v1189_v47 = vld [vmem:[%s1806_s9 + $0x28] sm:$0xff]   ;;  %s1983_s5 = scalar_lea.hbm %s2048_s4, %s1120_s25  ;;  %s873_s29 = scalar_lea.sflag [#allocation4], %s1800_s8 }
  0x8b   : > { %v370_v14 = vmax.f32 %v1123_v4, 0.0  ;;  %v371_v15 = vmax.f32 %v1124_v5, 0.0  ;;  %v372_v20 = vmax.f32 %v1127_v10, 0.0  ;;  %v373_v21 = vmax.f32 %v1128_v11, 0.0  ;;  %v1195_v28 = vld [vmem:[%s1806_s9 + $0x58] sm:$0xff]   ;;  %v1196_v42 = vld [vmem:[%s1806_s9 + $0x60] sm:$0xff]  }
  0x8c   : > { %v386_v16 = vmax.f32 %v1155_v6, 0.0  ;;  %v387_v19 = vmax.f32 %v1156_v9, 0.0  ;;  %v388_v22 = vmax.f32 %v1159_v12, 0.0  ;;  %v389_v25 = vmax.f32 %v1160_v17, 0.0  ;;  %v1197_v52 = vld [vmem:[%s1806_s9 + $0x68] sm:$0xff]   ;;  %v1190_v61 = vld [vmem:[%s1806_s9 + $0x30] sm:$0xff]  }
  0x8d   : > { %v402_v24 = vpack.c.bf16 %v371_v15, %v370_v14  ;;  %v1131_v26 = vunpack.c.l.bf16 %v1186_v13  ;;  %v1132_v27 = vunpack.c.h.bf16 %v1186_v13  ;;  %v403_v30 = vpack.c.bf16 %v373_v21, %v372_v20  ;;  %v1198_v2 = vld [vmem:[%s1806_s9 + $0x70] sm:$0xff]   ;;  %s1466_s28 = scalar_lea.vmem %s1985_s27, 2048  ;;  %s1564_s21 = smov [#allocation10]  }
  0x8e   : > { %v410_v29 = vpack.c.bf16 %v387_v19, %v386_v16  ;;  %v1163_v31 = vunpack.c.l.bf16 %v1194_v18  ;;  %v1164_v32 = vunpack.c.h.bf16 %v1194_v18  ;;  %v411_v34 = vpack.c.bf16 %v389_v25, %v388_v22  ;;  %v1191_v16 = vld [vmem:[%s1806_s9 + $0x38] sm:$0xff]   ;;  %p1467_p12 = scmp.ne.s32.totalorder %s1985_s27, %s1466_s28  ;;  %s1470_s22 = sshll.u32 %s1564_s21, 4  ;;  %s1471_s22 = int_to_ptr.vmem [resolvable:$false] %s1470_s22 }
  0x8f   : > { %1219 = vmatprep.mubr.msk.bf16.mxu0 %vm419_vm1, %v402_v24  ;;  %v374_v35 = vmax.f32 %v1131_v26, 0.0  ;;  %v375_v36 = vmax.f32 %v1132_v27, 0.0  ;;  %v1135_v37 = vunpack.c.l.bf16 %v1187_v23  ;;  %v1136_v40 = vunpack.c.h.bf16 %v1187_v23  ;;  %v1199_v19 = vld [vmem:[%s1806_s9 + $0x78] sm:$0xff]   ;;  %s1472_s14 = scalar_lea.vmem %s1471_s22, 4096  ;;  %p1473_p6 = scmp.lt.s32.totalorder %s1985_s27, %s1471_s22 }
  0x90   : > { %1235 = vmatprep.mubr.msk.bf16.mxu1 %vm419_vm1, %v410_v29  ;;  %1220 = vmatmul.mubr.msk.bf16.vlgmr.msra.gmra.mrb[0].mxu0 %vm419_vm1, %v403_v30  ;;  %v390_v38 = vmax.f32 %v1163_v31, 0.0  ;;  %v391_v39 = vmax.f32 %v1164_v32, 0.0  ;;  %v1167_v41 = vunpack.c.l.bf16 %v1195_v28  ;;  %v1168_v45 = vunpack.c.h.bf16 %v1195_v28  ;;  %p1468_p1 = pnand %p1467_p12, %p1742_p2  ;;  %p1474_p8 = scmp.lt.s32.totalorder %s1472_s14, %s1466_s28 }
  0x91   : > { %1236 = vmatmul.mubr.msk.bf16.vlgmr.msra.gmra.mrb[0].mxu1 %vm419_vm1, %v411_v34  ;;  %v404_v43 = vpack.c.bf16 %v375_v36, %v374_v35  ;;  %v376_v44 = vmax.f32 %v1135_v37, 0.0  ;;  %v1139_v46 = vunpack.c.l.bf16 %v1188_v33  ;;  %v377_v49 = vmax.f32 %v1136_v40, 0.0  ;;  %v1852_v34 = vld [vmem:[#allocation7] ss:$0 sm:$0xff]  ;;  %v1854_v36 = vld [vmem:[#allocation8] ss:$0 sm:$0xff] }
  0x92   : > { %v412_v48 = vpack.c.bf16 %v391_v39, %v390_v38  ;;  %v392_v50 = vmax.f32 %v1167_v41, 0.0  ;;  %v1140_v51 = vunpack.c.h.bf16 %v1188_v33  ;;  %v393_v53 = vmax.f32 %v1168_v45, 0.0  ;;  %p1469_p4 = pneg %p1468_p1  ;;  %p1475_p0 = por %p1474_p8, %p1473_p6 }
  0x93   : > { %1223 = vmatprep.mubr.msk.bf16.mxu0 %vm419_vm1, %v404_v43  ;;  %v378_v54 = vmax.f32 %v1139_v46, 0.0  ;;  %v1171_v55 = vunpack.c.l.bf16 %v1196_v42  ;;  %v1172_v56 = vunpack.c.h.bf16 %v1196_v42  ;;  %v405_v57 = vpack.c.bf16 %v377_v49, %v376_v44 }
  0x94   : > { %1239 = vmatprep.mubr.msk.bf16.mxu1 %vm419_vm1, %v412_v48  ;;  %v379_v58 = vmax.f32 %v1140_v51, 0.0  ;;  %v1143_v59 = vunpack.c.l.bf16 %v1189_v47  ;;  %v1144_v60 = vunpack.c.h.bf16 %v1189_v47  ;;  %v413_v62 = vpack.c.bf16 %v393_v53, %v392_v50  ;;  %p1476_p5 = pnand %p1475_p0, %p1469_p4 }
  0x95   : > { %v394_v63 = vmax.f32 %v1171_v55, 0.0  ;;  %v395_v0 = vmax.f32 %v1172_v56, 0.0  ;;  %v1175_v1 = vunpack.c.l.bf16 %v1197_v52  ;;  %v1176_v4 = vunpack.c.h.bf16 %v1197_v52 }
  0x96   : > { %v406_v3 = vpack.c.bf16 %v379_v58, %v378_v54  ;;  %v1147_v6 = vunpack.c.l.bf16 %v1190_v61  ;;  %v1148_v7 = vunpack.c.h.bf16 %v1190_v61  ;;  %v380_v8 = vmax.f32 %v1143_v59, 0.0 }
  0x97   : > { %v414_v5 = vpack.c.bf16 %v395_v0, %v394_v63  ;;  %v381_v9 = vmax.f32 %v1144_v60, 0.0  ;;  %v1179_v10 = vunpack.c.l.bf16 %v1198_v2  ;;  %v1180_v11 = vunpack.c.h.bf16 %v1198_v2 }
  0x98   : > { %1224 = vmatmul.mubr.msk.bf16.gmra.mrb[4].mxu0 %vm419_vm1, %v405_v57  ;;  %v396_v12 = vmax.f32 %v1175_v1, 0.0  ;;  %v397_v13 = vmax.f32 %v1176_v4, 0.0  ;;  %v382_v14 = vmax.f32 %v1147_v6, 0.0  ;;  %v383_v15 = vmax.f32 %v1148_v7, 0.0 }
  0x99   : > { %1240 = vmatmul.mubr.msk.bf16.gmra.mrb[4].mxu1 %vm419_vm1, %v413_v62  ;;  %1227 = vmatprep.mubr.msk.bf16.mxu0 %vm419_vm1, %v406_v3  ;;  %v398_v17 = vmax.f32 %v1179_v10, 0.0  ;;  %v399_v18 = vmax.f32 %v1180_v11, 0.0  ;;  %v407_v20 = vpack.c.bf16 %v381_v9, %v380_v8  ;;  %v1151_v21 = vunpack.c.l.bf16 %v1191_v16 }
  0x9a   : > { %1243 = vmatprep.mubr.msk.bf16.mxu1 %vm419_vm1, %v414_v5  ;;  %v1152_v22 = vunpack.c.h.bf16 %v1191_v16  ;;  %v415_v23 = vpack.c.bf16 %v397_v13, %v396_v12  ;;  %v408_v24 = vpack.c.bf16 %v383_v15, %v382_v14  ;;  %v1183_v25 = vunpack.c.l.bf16 %v1199_v19 }
  0x9b   : > { %v1184_v26 = vunpack.c.h.bf16 %v1199_v19  ;;  %v416_v27 = vpack.c.bf16 %v399_v18, %v398_v17  ;;  %v384_v28 = vmax.f32 %v1151_v21, 0.0 }
  0x9c   : > { %v385_v29 = vmax.f32 %v1152_v22, 0.0  ;;  %v400_v30 = vmax.f32 %v1183_v25, 0.0 }
  0x9d   : > { %v401_v31 = vmax.f32 %v1184_v26, 0.0 }
  0x9e   : > { %v409_v32 = vpack.c.bf16 %v385_v29, %v384_v28 }
  0x9f   : > { %v417_v33 = vpack.c.bf16 %v401_v31, %v400_v30 }
  0xa0   : > { %1228 = vmatmul.mubr.msk.bf16.gmra.mrb[8].mxu0 %vm419_vm1, %v407_v20 }
  0xa1   : > { %1244 = vmatmul.mubr.msk.bf16.gmra.mrb[8].mxu1 %vm419_vm1, %v415_v23  ;;  %1231 = vmatprep.mubr.msk.bf16.mxu0 %vm419_vm1, %v408_v24 }
  0xa2   : > { %1247 = vmatprep.mubr.msk.bf16.mxu1 %vm419_vm1, %v416_v27 }
  0xa8   : > { %1232 = vmatmul.mubr.msk.bf16.gmra.mrb[12].mxu0 %vm419_vm1, %v409_v32 }
  0xa9   : > { %1248 = vmatmul.mubr.msk.bf16.gmra.mrb[12].mxu1 %vm419_vm1, %v417_v33 }
 0x163   : > { %v1221_v35 = vpop.f32.mrb[0].mxu0 }
 0x164   : > { %v642_v37 = vmul.f32 %v1221_v35, %v1852_v34  ;;  %v1237_v38 = vpop.f32.mrb[0].mxu1  ;;  %v506_v39 = vpop.f32.mrb[1].mxu0 }
 0x165   : > { %v658_v40 = vmul.f32 %v1237_v38, %v1852_v34  ;;  %v640_v41 = vmul.f32 %v1852_v34, %v506_v39  ;;  %v570_v42 = vpop.f32.mrb[1].mxu1  ;;  %v1222_v43 = vpop.f32.mrb[2].mxu0 }
 0x166   : > { %v681_v44 = vadd.f32 %v1854_v36, %v642_v37  ;;  %v656_v45 = vmul.f32 %v1852_v34, %v570_v42  ;;  %v643_v46 = vmul.f32 %v1222_v43, %v1852_v34  ;;  %v1238_v47 = vpop.f32.mrb[2].mxu1  ;;  %v509_v48 = vpop.f32.mrb[3].mxu0 }
 0x167   : > { %v697_v49 = vadd.f32 %v1854_v36, %v658_v40  ;;  %v679_v50 = vadd.f32 %v1854_v36, %v640_v41  ;;  %v659_v51 = vmul.f32 %v1238_v47, %v1852_v34  ;;  %v641_v52 = vmul.f32 %v1852_v34, %v509_v48  ;;  %v573_v53 = vpop.f32.mrb[3].mxu1 }
 0x168   : > { %v1090_v54 = vpack.c.bf16 %v681_v44, %v681_v44  ;;  %v695_v55 = vadd.f32 %v1854_v36, %v656_v45  ;;  %v682_v56 = vadd.f32 %v1854_v36, %v643_v46  ;;  %v657_v57 = vmul.f32 %v1852_v34, %v573_v53 }
 0x169   : > { %v1106_v58 = vpack.c.bf16 %v697_v49, %v697_v49  ;;  %v1088_v59 = vpack.c.bf16 %v679_v50, %v679_v50  ;;  %v698_v60 = vadd.f32 %v1854_v36, %v659_v51  ;;  %v680_v61 = vadd.f32 %v1854_v36, %v641_v52 }
 0x16a   : > { %842 = vst.msk [vmem:[%s1873_s23 + $0x8] sm:$0xf] %vm839_vm2, %v1090_v54  ;;  %v1104_v62 = vpack.c.bf16 %v695_v55, %v695_v55  ;;  %v1091_v63 = vpack.c.bf16 %v682_v56, %v682_v56  ;;  %v696_v0 = vadd.f32 %v1854_v36, %v657_v57 }
 0x16b   : > { %858 = vst.msk [vmem:[%s1873_s23 + $0x48] sm:$0xf] %vm839_vm2, %v1106_v58  ;;  %840 = vst.msk [vmem:[%s1873_s23] sm:$0xf] %vm839_vm2, %v1088_v59  ;;  %v1107_v1 = vpack.c.bf16 %v698_v60, %v698_v60  ;;  %v1089_v2 = vpack.c.bf16 %v680_v61, %v680_v61  ;;  %v1225_v3 = vpop.f32.mrb[4].mxu0 }
 0x16c   : > { %856 = vst.msk [vmem:[%s1873_s23 + $0x40] sm:$0xf] %vm839_vm2, %v1104_v62  ;;  %843 = vst.msk [vmem:[%s1873_s23 + $0xc] sm:$0xf] %vm839_vm2, %v1091_v63  ;;  %v1105_v4 = vpack.c.bf16 %v696_v0, %v696_v0  ;;  %v646_v5 = vmul.f32 %v1225_v3, %v1852_v34  ;;  %v1241_v6 = vpop.f32.mrb[4].mxu1  ;;  %v522_v7 = vpop.f32.mrb[5].mxu0 }
 0x16d   : > { %859 = vst.msk [vmem:[%s1873_s23 + $0x4c] sm:$0xf] %vm839_vm2, %v1107_v1  ;;  %841 = vst.msk [vmem:[%s1873_s23 + $0x4] sm:$0xf] %vm839_vm2, %v1089_v2  ;;  %v662_v8 = vmul.f32 %v1241_v6, %v1852_v34  ;;  %v644_v9 = vmul.f32 %v1852_v34, %v522_v7  ;;  %v586_v10 = vpop.f32.mrb[5].mxu1  ;;  %v1226_v11 = vpop.f32.mrb[6].mxu0 }
 0x16e   : > { %857 = vst.msk [vmem:[%s1873_s23 + $0x44] sm:$0xf] %vm839_vm2, %v1105_v4  ;;  %v685_v12 = vadd.f32 %v1854_v36, %v646_v5  ;;  %v660_v13 = vmul.f32 %v1852_v34, %v586_v10  ;;  %v647_v14 = vmul.f32 %v1226_v11, %v1852_v34  ;;  %v1242_v15 = vpop.f32.mrb[6].mxu1  ;;  %v525_v16 = vpop.f32.mrb[7].mxu0 }
 0x16f   : > { %v701_v17 = vadd.f32 %v1854_v36, %v662_v8  ;;  %v683_v18 = vadd.f32 %v1854_v36, %v644_v9  ;;  %v663_v19 = vmul.f32 %v1242_v15, %v1852_v34  ;;  %v645_v20 = vmul.f32 %v1852_v34, %v525_v16  ;;  %v589_v21 = vpop.f32.mrb[7].mxu1 }
 0x170   : > { %v1094_v22 = vpack.c.bf16 %v685_v12, %v685_v12  ;;  %v699_v23 = vadd.f32 %v1854_v36, %v660_v13  ;;  %v686_v24 = vadd.f32 %v1854_v36, %v647_v14  ;;  %v661_v25 = vmul.f32 %v1852_v34, %v589_v21 }
 0x171   : > { %v1110_v26 = vpack.c.bf16 %v701_v17, %v701_v17  ;;  %v1092_v27 = vpack.c.bf16 %v683_v18, %v683_v18  ;;  %v702_v28 = vadd.f32 %v1854_v36, %v663_v19  ;;  %v684_v29 = vadd.f32 %v1854_v36, %v645_v20 }
 0x172   : > { %846 = vst.msk [vmem:[%s1873_s23 + $0x18] sm:$0xf] %vm839_vm2, %v1094_v22  ;;  %v1108_v30 = vpack.c.bf16 %v699_v23, %v699_v23  ;;  %v1095_v31 = vpack.c.bf16 %v686_v24, %v686_v24  ;;  %v700_v32 = vadd.f32 %v1854_v36, %v661_v25 }
 0x173   : > { %862 = vst.msk [vmem:[%s1873_s23 + $0x58] sm:$0xf] %vm839_vm2, %v1110_v26  ;;  %844 = vst.msk [vmem:[%s1873_s23 + $0x10] sm:$0xf] %vm839_vm2, %v1092_v27  ;;  %v1111_v33 = vpack.c.bf16 %v702_v28, %v702_v28  ;;  %v1093_v35 = vpack.c.bf16 %v684_v29, %v684_v29  ;;  %v1229_v37 = vpop.f32.mrb[8].mxu0 }
 0x174   : > { %860 = vst.msk [vmem:[%s1873_s23 + $0x50] sm:$0xf] %vm839_vm2, %v1108_v30  ;;  %847 = vst.msk [vmem:[%s1873_s23 + $0x1c] sm:$0xf] %vm839_vm2, %v1095_v31  ;;  %v1109_v38 = vpack.c.bf16 %v700_v32, %v700_v32  ;;  %v650_v39 = vmul.f32 %v1229_v37, %v1852_v34  ;;  %v1245_v40 = vpop.f32.mrb[8].mxu1  ;;  %v538_v41 = vpop.f32.mrb[9].mxu0 }
 0x175   : > { %863 = vst.msk [vmem:[%s1873_s23 + $0x5c] sm:$0xf] %vm839_vm2, %v1111_v33  ;;  %845 = vst.msk [vmem:[%s1873_s23 + $0x14] sm:$0xf] %vm839_vm2, %v1093_v35  ;;  %v666_v42 = vmul.f32 %v1245_v40, %v1852_v34  ;;  %v648_v43 = vmul.f32 %v1852_v34, %v538_v41  ;;  %v602_v44 = vpop.f32.mrb[9].mxu1  ;;  %v1230_v45 = vpop.f32.mrb[10].mxu0 }
 0x176   : > { %861 = vst.msk [vmem:[%s1873_s23 + $0x54] sm:$0xf] %vm839_vm2, %v1109_v38  ;;  %v689_v46 = vadd.f32 %v1854_v36, %v650_v39  ;;  %v664_v47 = vmul.f32 %v1852_v34, %v602_v44  ;;  %v651_v48 = vmul.f32 %v1230_v45, %v1852_v34  ;;  %v1246_v49 = vpop.f32.mrb[10].mxu1  ;;  %v541_v50 = vpop.f32.mrb[11].mxu0 }
 0x177   : > { %v705_v51 = vadd.f32 %v1854_v36, %v666_v42  ;;  %v687_v52 = vadd.f32 %v1854_v36, %v648_v43  ;;  %v667_v53 = vmul.f32 %v1246_v49, %v1852_v34  ;;  %v649_v54 = vmul.f32 %v1852_v34, %v541_v50  ;;  %v605_v55 = vpop.f32.mrb[11].mxu1 }
 0x178   : > { %v1098_v56 = vpack.c.bf16 %v689_v46, %v689_v46  ;;  %v703_v57 = vadd.f32 %v1854_v36, %v664_v47  ;;  %v690_v58 = vadd.f32 %v1854_v36, %v651_v48  ;;  %v665_v59 = vmul.f32 %v1852_v34, %v605_v55 }
 0x179   : > { %v1114_v60 = vpack.c.bf16 %v705_v51, %v705_v51  ;;  %v1096_v61 = vpack.c.bf16 %v687_v52, %v687_v52  ;;  %v706_v62 = vadd.f32 %v1854_v36, %v667_v53  ;;  %v688_v63 = vadd.f32 %v1854_v36, %v649_v54 }
 0x17a   : > { %850 = vst.msk [vmem:[%s1873_s23 + $0x28] sm:$0xf] %vm839_vm2, %v1098_v56  ;;  %v1112_v0 = vpack.c.bf16 %v703_v57, %v703_v57  ;;  %v1099_v1 = vpack.c.bf16 %v690_v58, %v690_v58  ;;  %v704_v2 = vadd.f32 %v1854_v36, %v665_v59 }
 0x17b   : > { %866 = vst.msk [vmem:[%s1873_s23 + $0x68] sm:$0xf] %vm839_vm2, %v1114_v60  ;;  %848 = vst.msk [vmem:[%s1873_s23 + $0x20] sm:$0xf] %vm839_vm2, %v1096_v61  ;;  %v1115_v3 = vpack.c.bf16 %v706_v62, %v706_v62  ;;  %v1097_v4 = vpack.c.bf16 %v688_v63, %v688_v63  ;;  %v1233_v5 = vpop.f32.mrb[12].mxu0 }
 0x17c   : > { %864 = vst.msk [vmem:[%s1873_s23 + $0x60] sm:$0xf] %vm839_vm2, %v1112_v0  ;;  %851 = vst.msk [vmem:[%s1873_s23 + $0x2c] sm:$0xf] %vm839_vm2, %v1099_v1  ;;  %v1113_v6 = vpack.c.bf16 %v704_v2, %v704_v2  ;;  %v654_v7 = vmul.f32 %v1233_v5, %v1852_v34  ;;  %v1249_v8 = vpop.f32.mrb[12].mxu1  ;;  %v554_v9 = vpop.f32.mrb[13].mxu0 }
 0x17d   : > { %867 = vst.msk [vmem:[%s1873_s23 + $0x6c] sm:$0xf] %vm839_vm2, %v1115_v3  ;;  %849 = vst.msk [vmem:[%s1873_s23 + $0x24] sm:$0xf] %vm839_vm2, %v1097_v4  ;;  %v670_v10 = vmul.f32 %v1249_v8, %v1852_v34  ;;  %v652_v11 = vmul.f32 %v1852_v34, %v554_v9  ;;  %v618_v12 = vpop.f32.mrb[13].mxu1  ;;  %v1234_v13 = vpop.f32.mrb[14].mxu0 }
 0x17e   : > { %865 = vst.msk [vmem:[%s1873_s23 + $0x64] sm:$0xf] %vm839_vm2, %v1113_v6  ;;  %v693_v14 = vadd.f32 %v1854_v36, %v654_v7  ;;  %v668_v15 = vmul.f32 %v1852_v34, %v618_v12  ;;  %v655_v16 = vmul.f32 %v1234_v13, %v1852_v34  ;;  %v1250_v17 = vpop.f32.mrb[14].mxu1  ;;  %v557_v18 = vpop.f32.mrb[15].mxu0 }
 0x17f   : > { %v709_v19 = vadd.f32 %v1854_v36, %v670_v10  ;;  %v691_v20 = vadd.f32 %v1854_v36, %v652_v11  ;;  %v671_v21 = vmul.f32 %v1250_v17, %v1852_v34  ;;  %v653_v22 = vmul.f32 %v1852_v34, %v557_v18  ;;  %v621_v23 = vpop.f32.mrb[15].mxu1 }
 0x180   : > { %v1102_v24 = vpack.c.bf16 %v693_v14, %v693_v14  ;;  %v707_v25 = vadd.f32 %v1854_v36, %v668_v15  ;;  %v694_v26 = vadd.f32 %v1854_v36, %v655_v16  ;;  %v669_v27 = vmul.f32 %v1852_v34, %v621_v23 }
 0x181   : > { %v1118_v28 = vpack.c.bf16 %v709_v19, %v709_v19  ;;  %v1100_v29 = vpack.c.bf16 %v691_v20, %v691_v20  ;;  %v710_v30 = vadd.f32 %v1854_v36, %v671_v21  ;;  %v692_v31 = vadd.f32 %v1854_v36, %v653_v22 }
 0x182   : > { %854 = vst.msk [vmem:[%s1873_s23 + $0x38] sm:$0xf] %vm839_vm2, %v1102_v24  ;;  %v1116_v32 = vpack.c.bf16 %v707_v25, %v707_v25  ;;  %v1103_v33 = vpack.c.bf16 %v694_v26, %v694_v26  ;;  %v708_v34 = vadd.f32 %v1854_v36, %v669_v27 }
 0x183   : > { %870 = vst.msk [vmem:[%s1873_s23 + $0x78] sm:$0xf] %vm839_vm2, %v1118_v28  ;;  %852 = vst.msk [vmem:[%s1873_s23 + $0x30] sm:$0xf] %vm839_vm2, %v1100_v29  ;;  %v1119_v35 = vpack.c.bf16 %v710_v30, %v710_v30  ;;  %v1101_v37 = vpack.c.bf16 %v692_v31, %v692_v31 }
 0x184   : > { %868 = vst.msk [vmem:[%s1873_s23 + $0x70] sm:$0xf] %vm839_vm2, %v1116_v32  ;;  %855 = vst.msk [vmem:[%s1873_s23 + $0x3c] sm:$0xf] %vm839_vm2, %v1103_v33  ;;  %v1117_v36 = vpack.c.bf16 %v708_v34, %v708_v34 }
 0x185   : > { %871 = vst.msk [vmem:[%s1873_s23 + $0x7c] sm:$0xf] %vm839_vm2, %v1119_v35  ;;  %853 = vst.msk [vmem:[%s1873_s23 + $0x34] sm:$0xf] %vm839_vm2, %v1101_v37 }
 0x186   : > { %869 = vst.msk [vmem:[%s1873_s23 + $0x74] sm:$0xf] %vm839_vm2, %v1117_v36 }
 0x187   : > { %1479 = shalt.err (!%p1476_p5)
}
 0x188   : > { %s1480_s30 = scalar_lea.hbm %s1983_s5, 2048  ;;  %s1484_s13 = scalar_lea.hbm %s2048_s4, 4096 }
 0x189   : > { %p1481_p10 = scmp.ne.s32.totalorder %s1983_s5, %s1480_s30  ;;  %p1485_p3 = scmp.lt.u32.totalorder %s1983_s5, %s2048_s4 }
 0x18a   : > { %p1486_p7 = scmp.lt.u32.totalorder %s1484_s13, %s1480_s30  ;;  %p1488_p12 = scmp.lt.u32.totalorder %s1480_s30, %s1983_s5 }
 0x18b   : > { %p1482_p13 = pnand %p1481_p10, %p1742_p2 }
 0x18c   : > { %p1487_p11 = por %p1486_p7, %p1485_p3 }
 0x18d   : > { %p1483_p9 = pneg %p1482_p13 }
 0x18e   : > { %p1489_p1 = por %p1488_p12, %p1487_p11 }
 0x190   : > { %p1490_p4 = pnand %p1489_p1, %p1483_p9 }
 0x192   : > { %1493 = shalt.err (!%p1490_p4)
}
 0x193   : > { %s1565_s25 = smov 64   ;;  %s1566_s18 = smov 4  }
 0x194   : > { %1269 = dma.vmem_to_hbm [thread:$0]  (%p1742_p2), %s1985_s27, 2048, %s1983_s5, %s873_s29, %s1565_s25, %s1565_s25, %s1566_s18  }
 0x195 PF: > { %s905_s24 = sand.u32 1, %s1536_s15   ;;  %p2066_p6 = scmp.ne.s32.totalorder %s2056_s26, 0 }
 0x196   : > { %p2067_p8 = scmp.ge.s32.totalorder %s1556_s20, 2  ;;  %s906_s28 = scalar_lea.sflag [#allocation4], %s905_s24 }
 0x198   : > { %p1286_p0 = pnand %p2067_p8, %p2066_p6 }
 0x19a   : > { %1531 = dma.done.wait (!%p1286_p0), %s906_s28, 2048  }
 0x19b   : > { %1533 = vsyncadd (!%p1286_p0), %s906_s28, 4294965248  ;;  %s22_s20 = sadd.s32 1, %s1556_s20   ;;  %s2068_s15 = smov %s1540_s16 }
 0x19c   : > { %p19_p5 = scmp.ge.s32.totalorder %s22_s20, 4   ;;  %s2069_s16 = smov %s1544_s17 }
 0x19d   : > { %s2070_s17 = smov %s1754_s12  ;;  %s2071_s18 = smov %s1552_s19 }
 0x19e   : > { %s2072_s19 = smov %s2074_s7  ;;  %21 = sbr.rel (!%p19_p5) target bundleno = 8 (0x8), region = 96 }
 0x1a5   :  { %911 = vsyncpa [#allocation3], 1 }
 0x1a6   :  { %913 = vsyncpa [#allocation3 + $0x1], 1 }
 0x1a7   :  { %914 = vsyncpa [#allocation6], 1 }
 0x1a8   :  { %915 = vsyncpa [#allocation9], 1 }
 0x1a9   :  { %916 = vsyncpa [#allocation4], 1 }
 0x1aa   :  { %918 = vsyncpa [#allocation4 + $0x1], 1 }

</bundles_post_ra>
